<compile_context>
chip_gen: v6e
topology: v6e:2x2x1
jax: 0.10.0
libtpu: 0.0.40
codegen_flags: <defaults>
</compile_context>

<pallas_src>
import numpy as np
import jax
import jax.numpy as jnp
from jax import lax
from jax.experimental import pallas as pl
from jax.experimental.pallas import tpu as pltpu


def _round_up(x: int, m: int) -> int:
    return (x + m - 1) // m * m


def _make_kernel(nsample: int, group: int, max_r2: float, min_r2: float):
    n_groups = nsample // group

    def kernel(tri_ref, pts_ref, xyz_ref, q_ref, out_ref, cnt_ref, col0_ref):
        n = pl.program_id(2)
        n_last = pl.num_programs(2) - 1

        ct, nt = pts_ref.shape                    # (ct, NT)
        npt = q_ref.shape[1]                      # 128

        pts = pts_ref[...]                        # (ct, NT)   rows 0..2 = x,y,z
        xyzn = xyz_ref[...]                       # (NT, 3)
        qc = q_ref[...]                           # (3, NPT)

        # ---- per-(b, p) state init on the first N tile ----------------------------
        @pl.when(n == 0)
        def _init():
            out_ref[...] = jnp.zeros_like(out_ref)
            cnt_ref[...] = jnp.zeros_like(cnt_ref)
            # point 0's column is needed for the "no point in ball -> index 0" case
            col0_ref[...] = jnp.broadcast_to(pts[:, 0:1], (ct, npt))

        cnt_carry = cnt_ref[...]                  # (1, NPT) valid points seen so far

        # ---- dilated ball membership (VPU), (NT, NPT) layout -----------------------
        dx = xyzn[:, 0:1] - qc[0:1, :]
        dy = xyzn[:, 1:2] - qc[1:2, :]
        dz = xyzn[:, 2:3] - qc[2:3, :]
        d2 = dx * dx + dy * dy + dz * dz
        mask = jnp.logical_and(d2 >= min_r2, d2 < max_r2).astype(jnp.float32)

        # ---- inclusive prefix count along the point axis, on the MXU ---------------
        # cum[j, p] = sum_{i <= j} mask[i, p]; exact (0/1 bf16 operands, f32 accumulate).
        cum = jnp.dot(tri_ref[...], mask.astype(jnp.bfloat16),
                      preferred_element_type=jnp.float32)           # (NT, NPT)
        tile_cnt = cum[nt - 1:nt, :]                                 # (1, NPT)

        # ---- gather: slot s's point falls in this tile iff cum == s+1-carry --------
        def gather_group(g, carry):
            s0 = g * group
            t0 = (s0 + 1).astype(jnp.float32) - cnt_carry            # (1, NPT)
            oh0 = jnp.where(cum == t0, mask, 0.0)                    # (NT, NPT) one-hot
            if group == 2:
                oh1 = jnp.where(cum == t0 + 1.0, mask, 0.0)
                oh = jnp.concatenate([oh0, oh1], axis=1)             # (NT, 2*NPT)
            else:
                oh = oh0
            res = jnp.dot(pts, oh, preferred_element_type=jnp.float32)   # (ct, G*NPT)
            out_ref[s0] = out_ref[s0] + res[:, :npt]
            if group == 2:
                out_ref[s0 + 1] = out_ref[s0 + 1] + res[:, npt:]
            return carry

        lax.fori_loop(0, n_groups, gather_group, 0)

        cnt_total = cnt_carry + tile_cnt
        cnt_ref[...] = cnt_total

        # ---- last N tile: replicate-first / empty fixups + center subtraction ------
        @pl.when(n == n_last)
        def _finalize():
            if ct > 3:
                q_pad = jnp.concatenate(
                    [qc, jnp.zeros((ct - 3, npt), jnp.float32)], axis=0)   # (ct, NPT)
            else:
                q_pad = qc
            # slot-0 gathered value; falls back to point 0 when the ball is empty
            base = jnp.where(cnt_total >= 1.0, out_ref[0], col0_ref[...])

            def fix_slot(s, carry):
                filled = cnt_total >= (s + 1).astype(jnp.float32)    # (1, NPT)
                out_ref[s] = jnp.where(filled, out_ref[s], base) - q_pad
                return carry

            lax.fori_loop(0, nsample, fix_slot, 0)

    return kernel


def query_dilated_and_group(xyz, new_xyz, features=None, radius_in=1.0, radius_out=0.0,
                            nsample=16, use_xyz=True, torch_layout=True):
    """JAX/Pallas equivalent of QueryDilatedAndGroup.forward.

    torch_layout=True  -> (B, 3+C, npoint, nsample)  (PyTorch module layout, default)
    torch_layout=False -> (B, nsample, 3+C, npoint)  kernel-native layout; consumers that
                          reduce over nsample should use it to skip a full-output HBM
                          transpose.
    """
    assert use_xyz or features is not None, \
        "Cannot have not features and not use xyz as a feature!"
    xyz = jnp.asarray(xyz, jnp.float32)
    new_xyz = jnp.asarray(new_xyz, jnp.float32)
    B, N, _ = xyz.shape
    npoint = new_xyz.shape[1]
    assert N < (1 << 24), "f32-exact prefix counts require N < 2**24"
    assert nsample >= 1

    # The module calls ball_query_dilated(radius_in, radius_out, nsample, ...) whose
    # signature is (max_radius, min_radius, ...): radius_in is the OUTER radius.
    max_r2 = float(radius_in) ** 2
    min_r2 = float(radius_out) ** 2

    # ---- tiling ----
    NPT = 128                                   # lane-dense npoint tile (256-wide MXU via G=2 slots/dot)
    npoint_pad = _round_up(npoint, NPT)
    n_ptiles = npoint_pad // NPT
    n_pad1 = _round_up(N, 128)
    NT = min(512, n_pad1)                       # bounded N tile -> peak VMEM independent of N
    N_pad = _round_up(n_pad1, NT)
    n_ntiles = N_pad // NT

    # pad N with far-away points so they can never fall inside any query ball
    if N_pad != N:
        xyz_p = jnp.pad(xyz, ((0, 0), (0, N_pad - N), (0, 0)), constant_values=1.0e6)
    else:
        xyz_p = xyz
    xyz_t = jnp.transpose(xyz_p, (0, 2, 1))                          # (B, 3, N_pad)
    if features is not None:
        feats = jnp.asarray(features, jnp.float32)
        if N_pad != N:
            feats = jnp.pad(feats, ((0, 0), (0, 0), (0, N_pad - N)))
        pts_t = jnp.concatenate([xyz_t, feats], axis=1)              # (B, ct, N_pad)
    else:
        pts_t = xyz_t
    ct = pts_t.shape[1]                                              # 3 + C

    q = new_xyz
    if npoint_pad != npoint:
        q = jnp.pad(q, ((0, 0), (0, npoint_pad - npoint), (0, 0)))
    q_t = jnp.transpose(q, (0, 2, 1))                                # (B, 3, npoint_pad)

    # constant lower-triangular (inclusive) prefix operand; 0/1 are exact in bf16.
    tri = (jax.lax.broadcasted_iota(jnp.int32, (NT, NT), 0) >=
           jax.lax.broadcasted_iota(jnp.int32, (NT, NT), 1)).astype(jnp.bfloat16)

    group = 2 if nsample % 2 == 0 else 1        # 2 slots per dot -> 256-lane MXU output
    kernel = _make_kernel(nsample, group, max_r2, min_r2)

    flops = 2 * B * n_ptiles * N_pad * NPT * (nsample * ct + NT)
    bytes_accessed = (4 * B * n_ptiles * (ct + 3) * N_pad
                      + 4 * B * (nsample * ct + 3) * npoint_pad
                      + 2 * NT * NT)
    cost = pl.CostEstimate(flops=flops, transcendentals=0, bytes_accessed=bytes_accessed)

    out = pl.pallas_call(
        kernel,
        out_shape=jax.ShapeDtypeStruct((B, nsample, ct, npoint_pad), jnp.float32),
        grid=(B, n_ptiles, n_ntiles),
        in_specs=[
            pl.BlockSpec((NT, NT), lambda b, p, n: (0, 0)),           # tri (stays resident)
            pl.BlockSpec((None, ct, NT), lambda b, p, n: (b, 0, n)),  # points (stream over N)
            pl.BlockSpec((None, NT, 3), lambda b, p, n: (b, n, 0)),   # xyz rows (stream over N)
            pl.BlockSpec((None, 3, NPT), lambda b, p, n: (b, 0, p)),  # query centers
        ],
        out_specs=pl.BlockSpec((None, nsample, ct, NPT),
                               lambda b, p, n: (b, 0, 0, p)),          # revisited accumulator
        scratch_shapes=[
            pltpu.VMEM((1, NPT), jnp.float32),    # running in-ball count carried over N tiles
            pltpu.VMEM((ct, NPT), jnp.float32),   # point-0 column (empty-ball fixup)
        ],
        compiler_params=pltpu.CompilerParams(
            dimension_semantics=("parallel", "parallel", "arbitrary"),
            vmem_limit_bytes=32 * 1024 * 1024),
        cost_estimate=cost,
    )(tri, pts_t, xyz_p, q_t)

    if not torch_layout:
        nf = out[..., :npoint] if npoint_pad != npoint else out
        if features is not None and not use_xyz:
            nf = nf[:, :, 3:, :]
        return nf

    # TODO(synk): fuse this full-output transpose into the consumer (e.g. reduce max over
    # nsample directly on the (B, nsample, ct, npoint) kernel layout via torch_layout=False).
    new_features = jnp.transpose(out, (0, 2, 3, 1))                  # (B, ct, npoint_pad, nsample)
    if npoint_pad != npoint:
        new_features = new_features[:, :, :npoint, :]
    if features is not None and not use_xyz:
        new_features = new_features[:, 3:]
    return new_features


def _reference(xyz, new_xyz, features, max_r, min_r, nsample, use_xyz):
    """Pure NumPy re-implementation of the CUDA forward semantics."""
    xyz = np.asarray(xyz, np.float32)
    new_xyz = np.asarray(new_xyz, np.float32)
    B, N, _ = xyz.shape
    npoint = new_xyz.shape[1]
    max2, min2 = float(max_r) ** 2, float(min_r) ** 2
    idx = np.zeros((B, npoint, nsample), dtype=np.int64)
    for b in range(B):
        for j in range(npoint):
            d = xyz[b] - new_xyz[b, j]
            d2 = (d[:, 0] * d[:, 0] + d[:, 1] * d[:, 1] + d[:, 2] * d[:, 2]).astype(np.float32)
            valid = np.nonzero((d2 >= min2) & (d2 < max2))[0]
            if valid.size:
                take = valid[:nsample]
                idx[b, j, :] = take[0]          # replicate-first semantics
                idx[b, j, :take.size] = take
    gx = np.stack([xyz[b].T[:, idx[b]] for b in range(B)], 0)        # (B,3,npoint,nsample)
    gx = gx - new_xyz.transpose(0, 2, 1)[..., None]
    if features is None:
        return gx
    features = np.asarray(features, np.float32)
    gf = np.stack([features[b][:, idx[b]] for b in range(B)], 0)     # (B,C,npoint,nsample)
    return np.concatenate([gx, gf], axis=1) if use_xyz else gf


if __name__ == "__main__":
    # --- test 1: small single-tile case -----------------------------------------
    B, N, npoint, C, nsample = 2, 128, 16, 4, 8
    radius_in, radius_out = 0.8, 0.1            # outer (max) / inner (min) radius
    k1, k2, k3 = jax.random.split(jax.random.PRNGKey(0), 3)
    xyz = jax.random.uniform(k1, (B, N, 3), dtype=jnp.float32)
    new_xyz = jax.random.uniform(k2, (B, npoint, 3), dtype=jnp.float32)
    features = jax.random.normal(k3, (B, C, N), dtype=jnp.float32)

    out = query_dilated_and_group(xyz, new_xyz, features,
                                  radius_in, radius_out, nsample, use_xyz=True)
    out = jax.block_until_ready(out)
    assert out.shape == (B, 3 + C, npoint, nsample), out.shape
    ref = _reference(xyz, new_xyz, features, radius_in, radius_out, nsample, True)
    np.testing.assert_allclose(np.asarray(out), ref, rtol=1e-5, atol=1e-5)

    # --- test 2: multi-N-tile case with N / npoint padding, empty balls and
    #             partially-filled balls whose samples straddle the tile boundary ----
    B, N, npoint, C, nsample = 2, 600, 33, 6, 16
    radius_in, radius_out = 0.15, 0.05
    k1, k2, k3 = jax.random.split(jax.random.PRNGKey(1), 3)
    xyz = jax.random.uniform(k1, (B, N, 3), dtype=jnp.float32)
    new_xyz = jax.random.uniform(k2, (B, npoint, 3), dtype=jnp.float32)
    new_xyz = new_xyz.at[:, 0, :].set(10.0)     # guaranteed empty balls (idx == 0 path)
    features = jax.random.normal(k3, (B, C, N), dtype=jnp.float32)

    out2 = query_dilated_and_group(xyz, new_xyz, features,
                                   radius_in, radius_out, nsample, use_xyz=True)
    out2 = jax.block_until_ready(out2)
    assert out2.shape == (B, 3 + C, npoint, nsample), out2.shape
    ref2 = _reference(xyz, new_xyz, features, radius_in, radius_out, nsample, True)
    np.testing.assert_allclose(np.asarray(out2), ref2, rtol=1e-5, atol=1e-5)

    print("KERNEL_OK")
</pallas_src>

<mosaic_0001>
module attributes {stable_mosaic.version = 11 : i64} {
  func.func @kernel(%arg0: i32, %arg1: i32, %arg2: i32, %arg3: memref<128x128xbf16, #tpu.memory_space<vmem>>, %arg4: memref<1x7x128xf32, #tpu.memory_space<vmem>>, %arg5: memref<1x128x3xf32, #tpu.memory_space<vmem>>, %arg6: memref<1x3x128xf32, #tpu.memory_space<vmem>>, %arg7: memref<1x8x7x128xf32, #tpu.memory_space<vmem>>, %arg8: memref<1x128xf32, #tpu.memory_space<vmem>>, %arg9: memref<7x128xf32, #tpu.memory_space<vmem>>) attributes {dimension_semantics = [#tpu.dimension_semantics<parallel>, #tpu.dimension_semantics<parallel>, #tpu.dimension_semantics<arbitrary>], iteration_bounds = array<i64: 2, 1, 1>, scalar_prefetch = 0 : i64, scratch_operands = 2 : i64, tpu.core_type = #tpu.core_type<tc>, window_params = [{pipeline_mode = #tpu.pipeline_mode<synchronous>, transform_indices = @transform_0, window_bounds = array<i64: 128, 128>}, {transform_indices = @transform_1, window_bounds = array<i64: 1, 7, 128>}, {transform_indices = @transform_2, window_bounds = array<i64: 1, 128, 3>}, {transform_indices = @transform_3, window_bounds = array<i64: 1, 3, 128>}, {transform_indices = @transform_4, window_bounds = array<i64: 1, 8, 7, 128>}]} {
    %c0 = arith.constant 0 : index
    %c0_0 = arith.constant 0 : index
    %c0_1 = arith.constant 0 : index
    %0 = vector.load %arg4[%c0, %c0_0, %c0_1] : memref<1x7x128xf32, #tpu.memory_space<vmem>>, vector<1x7x128xf32>
    %1 = vector.shape_cast %0 : vector<1x7x128xf32> to vector<7x128xf32>
    %c0_2 = arith.constant 0 : index
    %c0_3 = arith.constant 0 : index
    %c0_4 = arith.constant 0 : index
    %2 = vector.load %arg5[%c0_2, %c0_3, %c0_4] : memref<1x128x3xf32, #tpu.memory_space<vmem>>, vector<1x128x3xf32>
    %3 = vector.shape_cast %2 : vector<1x128x3xf32> to vector<128x3xf32>
    %c0_5 = arith.constant 0 : index
    %c0_6 = arith.constant 0 : index
    %c0_7 = arith.constant 0 : index
    %4 = vector.load %arg6[%c0_5, %c0_6, %c0_7] : memref<1x3x128xf32, #tpu.memory_space<vmem>>, vector<1x3x128xf32>
    %5 = vector.shape_cast %4 : vector<1x3x128xf32> to vector<3x128xf32>
    %c0_i32 = arith.constant 0 : i32
    %6 = arith.cmpi eq, %arg2, %c0_i32 : i32
    %7 = arith.extui %6 : i1 to i32
    %c0_i32_8 = arith.constant 0 : i32
    %8 = arith.cmpi ne, %7, %c0_i32_8 : i32
    scf.if %8 {
      %cst_21 = arith.constant 0.000000e+00 : f32
      %47 = vector.broadcast %cst_21 : f32 to vector<8x7x128xf32>
      %c0_22 = arith.constant 0 : index
      %c0_23 = arith.constant 0 : index
      %c0_24 = arith.constant 0 : index
      %c0_25 = arith.constant 0 : index
      %48 = vector.load %arg7[%c0_22, %c0_23, %c0_24, %c0_25] : memref<1x8x7x128xf32, #tpu.memory_space<vmem>>, vector<1x8x7x128xf32>
      %49 = vector.shape_cast %48 : vector<1x8x7x128xf32> to vector<8x7x128xf32>
      %50 = vector.shape_cast %47 : vector<8x7x128xf32> to vector<1x8x7x128xf32>
      tpu.vector_store %arg7[%c0_22, %c0_23, %c0_24, %c0_25], %50 {strides = array<i32>} : memref<1x8x7x128xf32, #tpu.memory_space<vmem>>, vector<1x8x7x128xf32>,
      %cst_26 = arith.constant 0.000000e+00 : f32
      %51 = vector.broadcast %cst_26 : f32 to vector<1x128xf32>
      %c0_27 = arith.constant 0 : index
      %c0_28 = arith.constant 0 : index
      %52 = vector.load %arg8[%c0_27, %c0_28] : memref<1x128xf32, #tpu.memory_space<vmem>>, vector<1x128xf32>
      tpu.vector_store %arg8[%c0_27, %c0_28], %51 {strides = array<i32>} : memref<1x128xf32, #tpu.memory_space<vmem>>, vector<1x128xf32>,
      %53 = vector.extract_strided_slice %1 {offsets = [0, 0], sizes = [7, 1], strides = [1, 1]} : vector<7x128xf32> to vector<7x1xf32>
      %54 = vector.shape_cast %53 : vector<7x1xf32> to vector<7x1xf32>
      %55 = vector.broadcast %54 : vector<7x1xf32> to vector<7x128xf32>
      %c0_29 = arith.constant 0 : index
      %c0_30 = arith.constant 0 : index
      %56 = vector.load %arg9[%c0_29, %c0_30] : memref<7x128xf32, #tpu.memory_space<vmem>>, vector<7x128xf32>
      tpu.vector_store %arg9[%c0_29, %c0_30], %55 {strides = array<i32>} : memref<7x128xf32, #tpu.memory_space<vmem>>, vector<7x128xf32>,
    } else {
    }
    %c0_9 = arith.constant 0 : index
    %c0_10 = arith.constant 0 : index
    %9 = vector.load %arg8[%c0_9, %c0_10] : memref<1x128xf32, #tpu.memory_space<vmem>>, vector<1x128xf32>
    %10 = vector.extract_strided_slice %3 {offsets = [0, 0], sizes = [128, 1], strides = [1, 1]} : vector<128x3xf32> to vector<128x1xf32>
    %11 = vector.extract_strided_slice %5 {offsets = [0, 0], sizes = [1, 128], strides = [1, 1]} : vector<3x128xf32> to vector<1x128xf32>
    %12 = vector.broadcast %10 : vector<128x1xf32> to vector<128x128xf32>
    %13 = vector.broadcast %11 : vector<1x128xf32> to vector<128x128xf32>
    %14 = arith.subf %12, %13 : vector<128x128xf32>
    %15 = vector.extract_strided_slice %3 {offsets = [0, 1], sizes = [128, 1], strides = [1, 1]} : vector<128x3xf32> to vector<128x1xf32>
    %16 = vector.extract_strided_slice %5 {offsets = [1, 0], sizes = [1, 128], strides = [1, 1]} : vector<3x128xf32> to vector<1x128xf32>
    %17 = vector.broadcast %15 : vector<128x1xf32> to vector<128x128xf32>
    %18 = vector.broadcast %16 : vector<1x128xf32> to vector<128x128xf32>
    %19 = arith.subf %17, %18 : vector<128x128xf32>
    %20 = vector.extract_strided_slice %3 {offsets = [0, 2], sizes = [128, 1], strides = [1, 1]} : vector<128x3xf32> to vector<128x1xf32>
    %21 = vector.extract_strided_slice %5 {offsets = [2, 0], sizes = [1, 128], strides = [1, 1]} : vector<3x128xf32> to vector<1x128xf32>
    %22 = vector.broadcast %20 : vector<128x1xf32> to vector<128x128xf32>
    %23 = vector.broadcast %21 : vector<1x128xf32> to vector<128x128xf32>
    %24 = arith.subf %22, %23 : vector<128x128xf32>
    %25 = arith.mulf %14, %14 : vector<128x128xf32>
    %26 = arith.mulf %19, %19 : vector<128x128xf32>
    %27 = arith.addf %25, %26 : vector<128x128xf32>
    %28 = arith.mulf %24, %24 : vector<128x128xf32>
    %29 = arith.addf %27, %28 : vector<128x128xf32>
    %cst = arith.constant 0.00999999977 : f32
    %30 = vector.broadcast %cst : f32 to vector<128x128xf32>
    %31 = arith.cmpf oge, %29, %30 : vector<128x128xf32>
    %cst_11 = arith.constant 6.400000e-01 : f32
    %32 = vector.broadcast %cst_11 : f32 to vector<128x128xf32>
    %33 = arith.cmpf olt, %29, %32 : vector<128x128xf32>
    %34 = arith.andi %31, %33 : vector<128x128xi1>
    %35 = arith.extui %34 : vector<128x128xi1> to vector<128x128xi32>
    %36 = arith.sitofp %35 : vector<128x128xi32> to vector<128x128xf32>
    %c0_12 = arith.constant 0 : index
    %c0_13 = arith.constant 0 : index
    %37 = vector.load %arg3[%c0_12, %c0_13] : memref<128x128xbf16, #tpu.memory_space<vmem>>, vector<128x128xbf16>
    %38 = arith.truncf %36 : vector<128x128xf32> to vector<128x128xbf16>
    %cst_14 = arith.constant dense<0.000000e+00> : vector<128x128xf32>
    %39 = tpu.matmul %37, %38, %cst_14 {dimension_numbers = #tpu.dot_dimension_numbers<[1], [0], [0], [1], [0, 0, 1, 1], [], []>} : vector<128x128xbf16>, vector<128x128xbf16>, vector<128x128xf32> -> vector<128x128xf32>
    %40 = vector.extract_strided_slice %39 {offsets = [127, 0], sizes = [1, 128], strides = [1, 1]} : vector<128x128xf32> to vector<1x128xf32>
    %c0_i32_15 = arith.constant 0 : i32
    %c4_i32 = arith.constant 4 : i32
    %41 = arith.addi %c0_i32_15, %c4_i32 : i32
    %c1_i32 = arith.constant 1 : i32
    scf.for %arg10 = %c0_i32_15 to %41 step %c1_i32  : i32 {
      %c2_i32 = arith.constant 2 : i32
      %47 = arith.muli %arg10, %c2_i32 : i32
      %c1_i32_21 = arith.constant 1 : i32
      %48 = arith.addi %47, %c1_i32_21 : i32
      %49 = arith.sitofp %48 : i32 to f32
      %50 = vector.broadcast %49 : f32 to vector<1x128xf32>
      %51 = arith.subf %50, %9 : vector<1x128xf32>
      %52 = vector.broadcast %51 : vector<1x128xf32> to vector<128x128xf32>
      %53 = arith.cmpf oeq, %39, %52 : vector<128x128xf32>
      %cst_22 = arith.constant 0.000000e+00 : f32
      %54 = vector.broadcast %cst_22 : f32 to vector<128x128xf32>
      %55 = arith.select %53, %36, %54 : vector<128x128xi1>, vector<128x128xf32>
      %cst_23 = arith.constant 1.000000e+00 : f32
      %56 = vector.broadcast %cst_23 : f32 to vector<1x128xf32>
      %57 = arith.addf %51, %56 : vector<1x128xf32>
      %58 = vector.broadcast %57 : vector<1x128xf32> to vector<128x128xf32>
      %59 = arith.cmpf oeq, %39, %58 : vector<128x128xf32>
      %cst_24 = arith.constant 0.000000e+00 : f32
      %60 = vector.broadcast %cst_24 : f32 to vector<128x128xf32>
      %61 = arith.select %59, %36, %60 : vector<128x128xi1>, vector<128x128xf32>
      %62 = tpu.concatenate %55, %61 in 1 : vector<128x128xf32>, vector<128x128xf32> -> vector<128x256xf32>
      %cst_25 = arith.constant dense<0.000000e+00> : vector<7x256xf32>
      %63 = tpu.matmul %1, %62, %cst_25 {dimension_numbers = #tpu.dot_dimension_numbers<[1], [0], [0], [1], [0, 0, 1, 1], [], []>} : vector<7x128xf32>, vector<128x256xf32>, vector<7x256xf32> -> vector<7x256xf32>
      %c0_26 = arith.constant 0 : index
      %64 = arith.index_cast %47 : i32 to index
      %c0_27 = arith.constant 0 : index
      %c0_28 = arith.constant 0 : index
      %65 = vector.load %arg7[%c0_26, %64, %c0_27, %c0_28] : memref<1x8x7x128xf32, #tpu.memory_space<vmem>>, vector<1x1x7x128xf32>
      %66 = vector.shape_cast %65 : vector<1x1x7x128xf32> to vector<7x128xf32>
      %67 = vector.extract_strided_slice %63 {offsets = [0, 0], sizes = [7, 128], strides = [1, 1]} : vector<7x256xf32> to vector<7x128xf32>
      %68 = arith.addf %66, %67 : vector<7x128xf32>
      %c0_29 = arith.constant 0 : index
      %69 = arith.index_cast %47 : i32 to index
      %c0_30 = arith.constant 0 : index
      %c0_31 = arith.constant 0 : index
      %70 = vector.load %arg7[%c0_29, %69, %c0_30, %c0_31] : memref<1x8x7x128xf32, #tpu.memory_space<vmem>>, vector<1x1x7x128xf32>
      %71 = vector.shape_cast %70 : vector<1x1x7x128xf32> to vector<7x128xf32>
      %72 = vector.shape_cast %68 : vector<7x128xf32> to vector<1x1x7x128xf32>
      tpu.vector_store %arg7[%c0_29, %69, %c0_30, %c0_31], %72 {strides = array<i32>} : memref<1x8x7x128xf32, #tpu.memory_space<vmem>>, vector<1x1x7x128xf32>,
      %c1_i32_32 = arith.constant 1 : i32
      %73 = arith.addi %47, %c1_i32_32 : i32
      %c0_33 = arith.constant 0 : index
      %74 = arith.index_cast %73 : i32 to index
      %c0_34 = arith.constant 0 : index
      %c0_35 = arith.constant 0 : index
      %75 = vector.load %arg7[%c0_33, %74, %c0_34, %c0_35] : memref<1x8x7x128xf32, #tpu.memory_space<vmem>>, vector<1x1x7x128xf32>
      %76 = vector.shape_cast %75 : vector<1x1x7x128xf32> to vector<7x128xf32>
      %77 = vector.extract_strided_slice %63 {offsets = [0, 128], sizes = [7, 128], strides = [1, 1]} : vector<7x256xf32> to vector<7x128xf32>
      %78 = arith.addf %76, %77 : vector<7x128xf32>
      %c1_i32_36 = arith.constant 1 : i32
      %79 = arith.addi %47, %c1_i32_36 : i32
      %c0_37 = arith.constant 0 : index
      %80 = arith.index_cast %79 : i32 to index
      %c0_38 = arith.constant 0 : index
      %c0_39 = arith.constant 0 : index
      %81 = vector.load %arg7[%c0_37, %80, %c0_38, %c0_39] : memref<1x8x7x128xf32, #tpu.memory_space<vmem>>, vector<1x1x7x128xf32>
      %82 = vector.shape_cast %81 : vector<1x1x7x128xf32> to vector<7x128xf32>
      %83 = vector.shape_cast %78 : vector<7x128xf32> to vector<1x1x7x128xf32>
      tpu.vector_store %arg7[%c0_37, %80, %c0_38, %c0_39], %83 {strides = array<i32>} : memref<1x8x7x128xf32, #tpu.memory_space<vmem>>, vector<1x1x7x128xf32>,
    }
    %c4_i32_16 = arith.constant 4 : i32
    %42 = arith.addf %9, %40 : vector<1x128xf32>
    %c0_17 = arith.constant 0 : index
    %c0_18 = arith.constant 0 : index
    %43 = vector.load %arg8[%c0_17, %c0_18] : memref<1x128xf32, #tpu.memory_space<vmem>>, vector<1x128xf32>
    tpu.vector_store %arg8[%c0_17, %c0_18], %42 {strides = array<i32>} : memref<1x128xf32, #tpu.memory_space<vmem>>, vector<1x128xf32>,
    %c0_i32_19 = arith.constant 0 : i32
    %44 = arith.cmpi eq, %arg2, %c0_i32_19 : i32
    %45 = arith.extui %44 : i1 to i32
    %c0_i32_20 = arith.constant 0 : i32
    %46 = arith.cmpi ne, %45, %c0_i32_20 : i32
    scf.if %46 {
      %cst_21 = arith.constant 0.000000e+00 : f32
      %47 = vector.broadcast %cst_21 : f32 to vector<4x128xf32>
      %48 = tpu.concatenate %5, %47 in 0 : vector<3x128xf32>, vector<4x128xf32> -> vector<7x128xf32>
      %cst_22 = arith.constant 1.000000e+00 : f32
      %49 = vector.broadcast %cst_22 : f32 to vector<1x128xf32>
      %50 = arith.cmpf oge, %42, %49 : vector<1x128xf32>
      %c0_23 = arith.constant 0 : index
      %c0_24 = arith.constant 0 : index
      %c0_25 = arith.constant 0 : index
      %c0_26 = arith.constant 0 : index
      %51 = vector.load %arg7[%c0_23, %c0_24, %c0_25, %c0_26] : memref<1x8x7x128xf32, #tpu.memory_space<vmem>>, vector<1x1x7x128xf32>
      %52 = vector.shape_cast %51 : vector<1x1x7x128xf32> to vector<7x128xf32>
      %c0_27 = arith.constant 0 : index
      %c0_28 = arith.constant 0 : index
      %53 = vector.load %arg9[%c0_27, %c0_28] : memref<7x128xf32, #tpu.memory_space<vmem>>, vector<7x128xf32>
      %54 = vector.shape_cast %50 : vector<1x128xi1> to vector<1x128xi1>
      %55 = vector.broadcast %54 : vector<1x128xi1> to vector<7x128xi1>
      %56 = arith.select %55, %52, %53 : vector<7x128xi1>, vector<7x128xf32>
      %c0_i32_29 = arith.constant 0 : i32
      %c8_i32 = arith.constant 8 : i32
      %57 = arith.addi %c0_i32_29, %c8_i32 : i32
      %c1_i32_30 = arith.constant 1 : i32
      scf.for %arg10 = %c0_i32_29 to %57 step %c1_i32_30  : i32 {
        %c1_i32_32 = arith.constant 1 : i32
        %58 = arith.addi %arg10, %c1_i32_32 : i32
        %59 = arith.sitofp %58 : i32 to f32
        %60 = vector.broadcast %59 : f32 to vector<1x128xf32>
        %61 = arith.cmpf oge, %42, %60 : vector<1x128xf32>
        %c0_33 = arith.constant 0 : index
        %62 = arith.index_cast %arg10 : i32 to index
        %c0_34 = arith.constant 0 : index
        %c0_35 = arith.constant 0 : index
        %63 = vector.load %arg7[%c0_33, %62, %c0_34, %c0_35] : memref<1x8x7x128xf32, #tpu.memory_space<vmem>>, vector<1x1x7x128xf32>
        %64 = vector.shape_cast %63 : vector<1x1x7x128xf32> to vector<7x128xf32>
        %65 = vector.shape_cast %61 : vector<1x128xi1> to vector<1x128xi1>
        %66 = vector.broadcast %65 : vector<1x128xi1> to vector<7x128xi1>
        %67 = arith.select %66, %64, %56 : vector<7x128xi1>, vector<7x128xf32>
        %68 = arith.subf %67, %48 : vector<7x128xf32>
        %c0_36 = arith.constant 0 : index
        %69 = arith.index_cast %arg10 : i32 to index
        %c0_37 = arith.constant 0 : index
        %c0_38 = arith.constant 0 : index
        %70 = vector.load %arg7[%c0_36, %69, %c0_37, %c0_38] : memref<1x8x7x128xf32, #tpu.memory_space<vmem>>, vector<1x1x7x128xf32>
        %71 = vector.shape_cast %70 : vector<1x1x7x128xf32> to vector<7x128xf32>
        %72 = vector.shape_cast %68 : vector<7x128xf32> to vector<1x1x7x128xf32>
        tpu.vector_store %arg7[%c0_36, %69, %c0_37, %c0_38], %72 {strides = array<i32>} : memref<1x8x7x128xf32, #tpu.memory_space<vmem>>, vector<1x1x7x128xf32>,
      }
      %c8_i32_31 = arith.constant 8 : i32
    } else {
    }
    return
  }
  func.func @transform_0(%arg0: i32, %arg1: i32, %arg2: i32) -> (i32, i32) {
    %c0_i32 = arith.constant 0 : i32
    %c0_i32_0 = arith.constant 0 : i32
    %c0_i32_1 = arith.constant 0 : i32
    return %c0_i32, %c0_i32_0 : i32, i32
  }
  func.func @transform_1(%arg0: i32, %arg1: i32, %arg2: i32) -> (i32, i32, i32) {
    %c0_i32 = arith.constant 0 : i32
    %c0_i32_0 = arith.constant 0 : i32
    return %arg0, %c0_i32, %arg2 : i32, i32, i32
  }
  func.func @transform_2(%arg0: i32, %arg1: i32, %arg2: i32) -> (i32, i32, i32) {
    %c0_i32 = arith.constant 0 : i32
    %c0_i32_0 = arith.constant 0 : i32
    return %arg0, %arg2, %c0_i32 : i32, i32, i32
  }
  func.func @transform_3(%arg0: i32, %arg1: i32, %arg2: i32) -> (i32, i32, i32) {
    %c0_i32 = arith.constant 0 : i32
    %c0_i32_0 = arith.constant 0 : i32
    return %arg0, %c0_i32, %arg1 : i32, i32, i32
  }
  func.func @transform_4(%arg0: i32, %arg1: i32, %arg2: i32) -> (i32, i32, i32, i32) {
    %c0_i32 = arith.constant 0 : i32
    %c0_i32_0 = arith.constant 0 : i32
    %c0_i32_1 = arith.constant 0 : i32
    return %arg0, %c0_i32, %c0_i32_0, %arg1 : i32, i32, i32, i32
  }
}

</mosaic_0001>

<bundles_post_ra>
// kernel: tpu_custom_call.1
= control target key start
LH: loop header
LB: loop body
LE: loop exit
PB: predicated region body
PF: predicated region fallthrough
CT: control target
= control target key end

     0   :  { %s1609_s15 = smov 0   ;;  %s1611_s16 = smov 0   ;;  %s2097_s0 = inlined_call_operand.vmem [shape: bf16[128,128], index: 0, kind: input, shape index: {}]   ;;  %s2098_s1 = inlined_call_operand.vmem [shape: f32[2,7,128], index: 1, kind: input, shape index: {}]   ;;  %s2099_s2 = inlined_call_operand.vmem [shape: f32[2,128,3], index: 2, kind: input, shape index: {}]   ;;  %s2100_s3 = inlined_call_operand.vmem [shape: f32[2,3,128], index: 3, kind: input, shape index: {}]   ;;  %s2101_s4 = inlined_call_operand.vmem [shape: f32[2,8,7,128], index: 4, kind: output, shape index: {}]  }
   0x1   :  { %s1613_s17 = smov 0  }
   0x2 LB: > { %s33_s18 = sadd.s32 1, %s1562_s16  ;;  %p1298_p0 = scmp.ge.s32.totalorder %s1566_s17, 1  ;;  %s1566_s17 = sphi %s1613_s17, %s14_s17   ;;  %s1562_s16 = sphi %s1611_s16, %s2109_s16   ;;  %s1558_s15 = sphi %s1609_s15, %s2108_s15  }
   0x3   : > { %p35_p1 = scmp.ge.s32.totalorder %s33_s18, 2  ;;  %p218_p2 = scmp.lt.s32.totalorder %s1566_s17, 3 }
   0x5   : > { %s2111_s18 = smov (%p35_p1, %s33_s18), 0  ;;  %p219_p3 = pnand %p1298_p0, %p218_p2 }
   0x6   : > { %p265_p4 = scmp.lt.s32.totalorder (!%p219_p3), %s1558_s15, 1  ;;  %s1957_s29 = smov (!%p219_p3), 0  }
   0x7   : > { %222 = sbr.rel (%p219_p3) target bundleno = 765 (0x2fd), region = 36 }
   0xc   : > { %v1576_v0 = vmov 1   ;;  %v1577_v1 = vmov 0   ;;  %v1578_v2 = vmov 0.0   ;;  %s2113_s15 = smov (!%p265_p4, %s1558_s15), 1  ;;  %v1579_v7 = vmov 2   ;;  %v1528_v55 = vld [vmem:[%s2097_s0] sm:$0xff]  }
   0xd   : > { %1503 = vset.pattern.permute.xlu1 %v1576_v0  ;;  %1502 = vset.pattern.permute.xlu0 %v1577_v1  ;;  %328 = vst [vmem:[#allocation2] sm:$0x1] %v1578_v2  ;;  %s1386_s19 = sshll.u32 %s2113_s15, 7  ;;  %s1387_s23 = sshll.u32 %s2113_s15, 6  ;;  %v416_v21 = vlaneseq  ;;  %v1529_v56 = vld [vmem:[%s2097_s0 + $0x20] sm:$0xff]  }
   0xe   : > { %s1636_s22 = scalar_lea.vmem %s2099_s2, %s1386_s19  ;;  %s1643_s26 = scalar_lea.vmem %s2101_s4, %s1387_s23  ;;  %1422 = vmatprep.mubr.bf16.mxu0 %v1528_v55  ;;  %1430 = vmatprep.mubr.bf16.mxu1 %v1529_v56 }
   0xf   : > { %v313_v3 = vld [vmem:[%s1636_s22 + $0x70] sm:$0xff]  ;;  %320 = vst [vmem:[%s1643_s26] sm:$0x7f] %v1578_v2  ;;  %321 = vst [vmem:[%s1643_s26 + $0x8] sm:$0x7f] %v1578_v2  ;;  %v314_v5 = vld [vmem:[%s1636_s22 + $0x78] sm:$0xff]  ;;  %s1302_s27 = sshll.u32 %s2113_s15, 2 }
  0x10   : > { %493 = vperm.xlu1 %1503, %v313_v3   ;;  %408 = vperm.xlu0 %1502, %v313_v3   ;;  %322 = vst [vmem:[%s1643_s26 + $0x10] sm:$0x7f] %v1578_v2  ;;  %323 = vst [vmem:[%s1643_s26 + $0x18] sm:$0x7f] %v1578_v2  ;;  %v312_v6 = vld [vmem:[%s1636_s22 + $0x68] sm:$0xff]  ;;  %v310_v8 = vld [vmem:[%s1636_s22 + $0x58] sm:$0xff]  ;;  %s288_s30 = scalar_lea.vmem %s2100_s3, %s1302_s27 }
  0x11   : > { %324 = vst [vmem:[%s1643_s26 + $0x20] sm:$0x7f] %v1578_v2  ;;  %325 = vst [vmem:[%s1643_s26 + $0x28] sm:$0x7f] %v1578_v2  ;;  %v311_v9 = vld [vmem:[%s1636_s22 + $0x60] sm:$0xff]  ;;  %v308_v10 = vld [vmem:[%s1636_s22 + $0x48] sm:$0xff] }
  0x12   : > { %326 = vst [vmem:[%s1643_s26 + $0x30] sm:$0x7f] %v1578_v2  ;;  %327 = vst [vmem:[%s1643_s26 + $0x38] sm:$0x7f] %v1578_v2  ;;  %v306_v11 = vld [vmem:[%s1636_s22 + $0x38] sm:$0xff]  ;;  %v304_v12 = vld [vmem:[%s1636_s22 + $0x28] sm:$0xff] }
  0x13   : > { %v1674_v13 = vld [vmem:[%s1636_s22 + $0x18] sm:$0xff]  ;;  %v1679_v14 = vld [vmem:[%s1636_s22 + $0x8] sm:$0xff]  ;;  %v309_v15 = vld [vmem:[%s1636_s22 + $0x50] sm:$0xff]  ;;  %v1704_v22 = vshrl.u32 %v416_v21, 7  ;;  %s1299_s9 = sshll.u32 %s2113_s15, 3 }
  0x14   : > { %v1661_v4 = vld [vmem:[#allocation2] sm:$0x1]  ;;  %497 = vperm.xlu1 %1503, %v314_v5   ;;  %413 = vperm.xlu0 %1502, %v314_v5   ;;  %v305_v17 = vld [vmem:[%s1636_s22 + $0x30] sm:$0xff]  ;;  %s271_s12 = scalar_lea.vmem %s2098_s1, %s1299_s9 }
  0x15   : > { %v307_v16 = vld [vmem:[%s1636_s22 + $0x40] sm:$0xff]  ;;  %v301_v19 = vld [vmem:[%s1636_s22 + $0x10] sm:$0xff]  ;;  %v1711_v23 = vsub.s32 0, %v1704_v22  ;;  %v502_v24 = vsub.s32 1, %v1704_v22  ;;  %v586_v28 = vsub.s32 2, %v1704_v22 }
  0x16   : > { %v303_v18 = vld [vmem:[%s1636_s22 + $0x20] sm:$0xff] }
  0x17   : > { %v299_v20 = vld [vmem:[%s1636_s22] sm:$0xff] }
  0x18   : > { %1504 = vset.pattern.permute.xlu1 %v1579_v7  ;;  %403 = vperm.xlu0 %1502, %v312_v6   ;;  %v1715_v25 = vld [vmem:[%s288_s30] sm:$0x7] }
  0x19   : > { %581 = vperm.xlu1 %1504, %v314_v5   ;;  %v1721_v29 = vrot.slane %v1715_v25, %v1711_v23  ;;  %v1724_v30 = vrot.slane %v1715_v25, %v502_v24  ;;  %v1730_v35 = vrot.slane %v1715_v25, %v586_v28 }
  0x1c   : > { %393 = vperm.xlu0 %1502, %v310_v8  }
  0x1d   : > { %1505 = vset.pattern.permute.xlu1 %v1577_v1 }
  0x1e   : > { %398 = vperm.xlu1 %1505, %v311_v9  }
  0x20   : > { %383 = vperm.xlu0 %1502, %v308_v10  }
  0x22   : > { %1506 = vset.pattern.permute.xlu1 %v1576_v0 }
  0x23   : > { %485 = vperm.xlu1 %1506, %v311_v9  }
  0x24   : > { %373 = vperm.xlu0 %1502, %v306_v11  }
  0x27   : > { %489 = vperm.xlu1 %1506, %v312_v6  }
  0x28   : > { %363 = vperm.xlu0 %1502, %v304_v12  }
  0x2b   : > { %1507 = vset.pattern.permute.xlu1 %v1579_v7 }
  0x2c   : > { %573 = vperm.xlu1 %1507, %v312_v6   ;;  %353 = vperm.xlu0 %1502, %v1674_v13  }
  0x30   : > { %1508 = vset.pattern.permute.xlu1 %v1577_v1  ;;  %343 = vperm.xlu0 %1502, %v1679_v14  }
  0x31   : > { %388 = vperm.xlu1 %1508, %v309_v15  }
  0x34   : > { %1524 = vset.pattern.permute.xlu0 %v1579_v7 }
  0x35   : > { %1509 = vset.pattern.permute.xlu1 %v1576_v0  ;;  %577 = vperm.xlu0 %1524, %v313_v3  }
  0x36   : > { %477 = vperm.xlu1 %1509, %v309_v15  }
  0x39   : > { %569 = vperm.xlu0 %1524, %v311_v9  }
  0x3a   : > { %481 = vperm.xlu1 %1509, %v310_v8  }
  0x3d   : > { %561 = vperm.xlu0 %1524, %v309_v15  }
  0x3e   : > { %1510 = vset.pattern.permute.xlu1 %v1579_v7 }
  0x3f   : > { %565 = vperm.xlu1 %1510, %v310_v8  }
  0x41   : > { %553 = vperm.xlu0 %1524, %v307_v16  }
  0x43   : > { %1511 = vset.pattern.permute.xlu1 %v1577_v1 }
  0x44   : > { %378 = vperm.xlu1 %1511, %v307_v16  }
  0x45   : > { %545 = vperm.xlu0 %1524, %v305_v17  }
  0x48   : > { %1512 = vset.pattern.permute.xlu1 %v1576_v0 }
  0x49   : > { %469 = vperm.xlu1 %1512, %v307_v16   ;;  %537 = vperm.xlu0 %1524, %v303_v18  }
  0x4d   : > { %473 = vperm.xlu1 %1512, %v308_v10   ;;  %529 = vperm.xlu0 %1524, %v301_v19  }
  0x51   : > { %1513 = vset.pattern.permute.xlu1 %v1579_v7  ;;  %521 = vperm.xlu0 %1524, %v299_v20  }
  0x52   : > { %557 = vperm.xlu1 %1513, %v308_v10  }
  0x56   : > { %1514 = vset.pattern.permute.xlu1 %v1577_v1 }
  0x57   : > { %368 = vperm.xlu1 %1514, %v305_v17  }
  0x5b   : > { %1515 = vset.pattern.permute.xlu1 %v1576_v0 }
  0x5c   : > { %461 = vperm.xlu1 %1515, %v305_v17   ;;  %v1784_v17 = vld [vmem:[%s271_s12] sm:$0x7f] }
  0x60   : > { %465 = vperm.xlu1 %1515, %v306_v11  }
  0x64   : > { %1516 = vset.pattern.permute.xlu1 %v1579_v7 }
  0x65   : > { %549 = vperm.xlu1 %1516, %v306_v11  }
  0x69   : > { %1517 = vset.pattern.permute.xlu1 %v1577_v1 }
  0x6a   : > { %358 = vperm.xlu1 %1517, %v303_v18  }
  0x6e   : > { %1518 = vset.pattern.permute.xlu1 %v1576_v0 }
  0x6f   : > { %453 = vperm.xlu1 %1518, %v303_v18  }
  0x73   : > { %457 = vperm.xlu1 %1518, %v304_v12  }
  0x77   : > { %1519 = vset.pattern.permute.xlu1 %v1579_v7 }
  0x78   : > { %541 = vperm.xlu1 %1519, %v304_v12  }
  0x7c   : > { %1520 = vset.pattern.permute.xlu1 %v1577_v1 }
  0x7d   : > { %348 = vperm.xlu1 %1520, %v301_v19  }
  0x81   : > { %1521 = vset.pattern.permute.xlu1 %v1576_v0 }
  0x82   : > { %445 = vperm.xlu1 %1521, %v301_v19  }
  0x86   : > { %449 = vperm.xlu1 %1521, %v1674_v13  }
  0x8a   : > { %1522 = vset.pattern.permute.xlu1 %v1579_v7 }
  0x8b   : > { %v494_v26 = vpop.permute.xlu1 %493  ;;  %v409_v27 = vpop.permute.xlu0 %408  ;;  %533 = vperm.xlu1 %1522, %v1674_v13  }
  0x8c   : > { %v434_v3 = vsub.f32 %v409_v27, %v1721_v29 }
  0x8e   : > { %v618_v9 = vmul.f32 %v434_v3, %v434_v3 }
  0x8f   : > { %v498_v31 = vpop.permute.xlu1 %497  ;;  %v414_v32 = vpop.permute.xlu0 %413  ;;  %1523 = vset.pattern.permute.xlu1 %v1577_v1 }
  0x90   : > { %v519_v33 = vsub.f32 %v498_v31, %v1724_v30  ;;  %v435_v34 = vsub.f32 %v414_v32, %v1721_v29  ;;  %338 = vperm.xlu1 %1523, %v299_v20  }
  0x92   : > { %v635_v36 = vmul.f32 %v519_v33, %v519_v33  ;;  %v619_v37 = vmul.f32 %v435_v34, %v435_v34 }
  0x93   : > { %v404_v38 = vpop.permute.xlu0 %403 }
  0x94   : > { %v582_v39 = vpop.permute.xlu1 %581  ;;  %1525 = vset.pattern.permute.xlu1 %v1576_v0  ;;  %v651_v41 = vadd.f32 %v635_v36, %v619_v37  ;;  %v433_v51 = vsub.f32 %v404_v38, %v1721_v29  ;;  %v518_v0 = vsub.f32 %v494_v26, %v1724_v30 }
  0x95   : > { %v603_v40 = vsub.f32 %v582_v39, %v1730_v35  ;;  %437 = vperm.xlu1 %1525, %v299_v20  }
  0x96   : > { %v617_v57 = vmul.f32 %v433_v51, %v433_v51  ;;  %v634_v8 = vmul.f32 %v518_v0, %v518_v0 }
  0x97   : > { %v667_v42 = vmul.f32 %v603_v40, %v603_v40  ;;  %v394_v43 = vpop.permute.xlu0 %393 }
  0x98   : > { %v650_v19 = vadd.f32 %v634_v8, %v618_v9  ;;  %v431_v24 = vsub.f32 %v394_v43, %v1721_v29 }
  0x99   : > { %v683_v44 = vadd.f32 %v667_v42, %v651_v41  ;;  %v399_v45 = vpop.permute.xlu1 %398  ;;  %441 = vperm.xlu1 %1525, %v1679_v14  }
  0x9a   : > { %v615_v39 = vmul.f32 %v431_v24, %v431_v24 }
  0x9b   : > { %vm699_vm0 = vcmp.ge.f32.partialorder %v683_v44, 0.01  ;;  %vm715_vm1 = vcmp.lt.f32.partialorder %v683_v44, 0.64  ;;  %v1735_v46 = vpop.permute.xlu0 %383 }
  0x9c   : > { %vm1737_vm2 = vmand %vm699_vm0, %vm715_vm1 }
  0x9d   : > { %1526 = vset.pattern.permute.xlu1 %v1579_v7  ;;  %v1745_v48 = vsel %vm1737_vm2, 1.0, %v1578_v2 }
  0x9e   : > { %v486_v49 = vpop.permute.xlu1 %485  ;;  %525 = vperm.xlu1 %1526, %v1679_v14   ;;  %v432_v14 = vsub.f32 %v399_v45, %v1721_v29 }
  0x9f   : > { %v1748_v50 = vpop.permute.xlu0 %373  ;;  %v516_v10 = vsub.f32 %v486_v49, %v1724_v30 }
  0xa0   : > { %v616_v28 = vmul.f32 %v432_v14, %v432_v14 }
  0xa1   : > { %v632_v20 = vmul.f32 %v516_v10, %v516_v10 }
  0xa2   : > { %v490_v52 = vpop.permute.xlu1 %489  ;;  %1527 = vset.pattern.permute.xlu1 %v1577_v1 }
  0xa3   : > { %v517_v53 = vsub.f32 %v490_v52, %v1724_v30  ;;  %v1753_v54 = vpop.permute.xlu0 %363  ;;  %331 = vperm.xlu1 %1527, %v1784_v17   ;;  %v648_v37 = vadd.f32 %v632_v20, %v616_v28  ;;  %v1580_v52 = vmov 1.0|1.0  }
  0xa5   : > { %v633_v58 = vmul.f32 %v517_v53, %v517_v53 }
  0xa7   : > { %v574_v59 = vpop.permute.xlu1 %573  ;;  %v1761_v60 = vpop.permute.xlu0 %353  ;;  %v649_v62 = vadd.f32 %v633_v58, %v617_v57 }
  0xa8   : > { %v601_v61 = vsub.f32 %v574_v59, %v1730_v35 }
  0xaa   : > { %v665_v63 = vmul.f32 %v601_v61, %v601_v61 }
  0xab   : > { %v1766_v5 = vpop.permute.xlu0 %343 }
  0xac   : > { %v681_v6 = vadd.f32 %v665_v63, %v649_v62  ;;  %v389_v7 = vpop.permute.xlu1 %388 }
  0xad   : > { %v430_v26 = vsub.f32 %v389_v7, %v1721_v29 }
  0xae   : > { %vm697_vm3 = vcmp.ge.f32.partialorder %v681_v6, 0.01  ;;  %vm713_vm4 = vcmp.lt.f32.partialorder %v681_v6, 0.64 }
  0xaf   : > { %vm1769_vm5 = vmand %vm697_vm3, %vm713_vm4  ;;  %v614_v40 = vmul.f32 %v430_v26, %v430_v26 }
  0xb0   : > { %v578_v12 = vpop.permute.xlu0 %577  ;;  %v1777_v13 = vsel %vm1769_vm5, 1.0, %v1578_v2 }
  0xb1   : > { %v602_v15 = vsub.f32 %v578_v12, %v1730_v35  ;;  %v478_v16 = vpop.permute.xlu1 %477  ;;  %v429_v12 = vsub.f32 %v1735_v46, %v1721_v29 }
  0xb2   : > { %v514_v18 = vsub.f32 %v478_v16, %v1724_v30 }
  0xb3   : > { %v666_v21 = vmul.f32 %v602_v15, %v602_v15 }
  0xb4   : > { %v570_v27 = vpop.permute.xlu0 %569  ;;  %v630_v34 = vmul.f32 %v514_v18, %v514_v18 }
  0xb5   : > { %v682_v31 = vadd.f32 %v666_v21, %v650_v19  ;;  %v600_v32 = vsub.f32 %v570_v27, %v1730_v35  ;;  %v482_v33 = vpop.permute.xlu1 %481  ;;  %v613_v19 = vmul.f32 %v429_v12, %v429_v12 }
  0xb6   : > { %v515_v36 = vsub.f32 %v482_v33, %v1724_v30  ;;  %v646_v49 = vadd.f32 %v630_v34, %v614_v40 }
  0xb7   : > { %vm698_vm6 = vcmp.ge.f32.partialorder %v682_v31, 0.01  ;;  %vm714_vm7 = vcmp.lt.f32.partialorder %v682_v31, 0.64  ;;  %v664_v38 = vmul.f32 %v600_v32, %v600_v32 }
  0xb8   : > { %v562_v41 = vpop.permute.xlu0 %561  ;;  %vm730_vm8 = vmand %vm698_vm6, %vm714_vm7  ;;  %v631_v43 = vmul.f32 %v515_v36, %v515_v36 }
  0xb9   : > { %v680_v42 = vadd.f32 %v664_v38, %v648_v37  ;;  %v598_v44 = vsub.f32 %v562_v41, %v1730_v35  ;;  %v1794_v45 = vsel %vm730_vm8, 1.0, %v1578_v2  ;;  %vm1329_vm9 = vmpackc.low %vm1737_vm2, %vm730_vm8 }
  0xba   : > { %v566_v51 = vpop.permute.xlu1 %565  ;;  %1406 = vmatprep.subr.msk.bf16.mxu0 %vm1329_vm9, %v1580_v52  ;;  %1438 = vmatprep.subr.msk.bf16.mxu1 %vm1329_vm9, %v1580_v52  ;;  %v647_v56 = vadd.f32 %v631_v43, %v615_v39 }
  0xbb   : > { %vm696_vm10 = vcmp.ge.f32.partialorder %v680_v42, 0.01  ;;  %vm712_vm11 = vcmp.lt.f32.partialorder %v680_v42, 0.64  ;;  %v662_v53 = vmul.f32 %v598_v44, %v598_v44  ;;  %v599_v55 = vsub.f32 %v566_v51, %v1730_v35  ;;  %1407 = vmatpush3.bf16.msk.msra.mxu0 %vm1329_vm9, %v1580_v52  ;;  %1446 = vmatpush3.bf16.msk.msra.mxu1 %vm1329_vm9, %v1580_v52 }
  0xbc   : > { %vm728_vm12 = vmand %vm696_vm10, %vm712_vm11  ;;  %v554_v62 = vpop.permute.xlu0 %553 }
  0xbd   : > { %v678_v47 = vadd.f32 %v662_v53, %v646_v49  ;;  %v663_v57 = vmul.f32 %v599_v55, %v599_v55  ;;  %v1804_v58 = vsel %vm728_vm12, 1.0, %v1578_v2  ;;  %vm1331_vm13 = vmpackc.low %vm1769_vm5, %vm728_vm12  ;;  %v596_v6 = vsub.f32 %v554_v62, %v1730_v35 }
  0xbe   : > { %1408 = vmatprep.subr.msk.bf16.mxu0 %vm1331_vm13, %v1580_v52  ;;  %1439 = vmatprep.subr.msk.bf16.mxu1 %vm1331_vm13, %v1580_v52  ;;  %v427_v49 = vsub.f32 %v1748_v50, %v1721_v29 }
  0xbf   : > { %vm694_vm14 = vcmp.ge.f32.partialorder %v678_v47, 0.01  ;;  %vm710_vm15 = vcmp.lt.f32.partialorder %v678_v47, 0.64  ;;  %v679_v59 = vadd.f32 %v663_v57, %v647_v56  ;;  %v379_v61 = vpop.permute.xlu1 %378  ;;  %1409 = vmatpush3.bf16.msk.msra.mxu0 %vm1331_vm13, %v1580_v52  ;;  %1447 = vmatpush3.bf16.msk.msra.mxu1 %vm1331_vm13, %v1580_v52  ;;  %v660_v11 = vmul.f32 %v596_v6, %v596_v6 }
  0xc0   : > { %vm726_vm0 = vmand %vm694_vm14, %vm710_vm15  ;;  %v428_v0 = vsub.f32 %v379_v61, %v1721_v29  ;;  %v546_v32 = vpop.permute.xlu0 %545  ;;  %v611_v56 = vmul.f32 %v427_v49, %v427_v49 }
  0xc1   : > { %vm695_vm1 = vcmp.ge.f32.partialorder %v679_v59, 0.01  ;;  %vm711_vm2 = vcmp.lt.f32.partialorder %v679_v59, 0.64  ;;  %v1813_v63 = vsel %vm726_vm0, 1.0, %v1578_v2  ;;  %v594_v36 = vsub.f32 %v546_v32, %v1730_v35 }
  0xc2   : > { %vm727_vm3 = vmand %vm695_vm1, %vm711_vm2  ;;  %v612_v9 = vmul.f32 %v428_v0, %v428_v0 }
  0xc3   : > { %v1817_v3 = vsel %vm727_vm3, 1.0, %v1578_v2  ;;  %vm1333_vm4 = vmpackc.low %vm727_vm3, %vm726_vm0  ;;  %v658_v41 = vmul.f32 %v594_v36, %v594_v36 }
  0xc4   : > { %v470_v7 = vpop.permute.xlu1 %469  ;;  %1410 = vmatprep.subr.msk.bf16.mxu0 %vm1333_vm4, %v1580_v52  ;;  %1440 = vmatprep.subr.msk.bf16.mxu1 %vm1333_vm4, %v1580_v52  ;;  %v538_v6 = vpop.permute.xlu0 %537 }
  0xc5   : > { %v512_v8 = vsub.f32 %v470_v7, %v1724_v30  ;;  %1411 = vmatpush3.bf16.msk.msra.mxu0 %vm1333_vm4, %v1580_v52  ;;  %1448 = vmatpush3.bf16.msk.msra.mxu1 %vm1333_vm4, %v1580_v52 }
  0xc7   : > { %v628_v10 = vmul.f32 %v512_v8, %v512_v8  ;;  %v592_v8 = vsub.f32 %v538_v6, %v1730_v35 }
  0xc8   : > { %v474_v14 = vpop.permute.xlu1 %473 }
  0xc9   : > { %v644_v15 = vadd.f32 %v628_v10, %v612_v9  ;;  %v513_v16 = vsub.f32 %v474_v14, %v1724_v30  ;;  %v656_v14 = vmul.f32 %v592_v8, %v592_v8 }
  0xcb   : > { %v676_v18 = vadd.f32 %v660_v11, %v644_v15  ;;  %v629_v20 = vmul.f32 %v513_v16, %v513_v16 }
  0xcd   : > { %vm692_vm5 = vcmp.ge.f32.partialorder %v676_v18, 0.01  ;;  %vm708_vm6 = vcmp.lt.f32.partialorder %v676_v18, 0.64  ;;  %v558_v21 = vpop.permute.xlu1 %557  ;;  %v645_v27 = vadd.f32 %v629_v20, %v613_v19  ;;  %v425_v19 = vsub.f32 %v1753_v54, %v1721_v29 }
  0xce   : > { %v597_v24 = vsub.f32 %v558_v21, %v1730_v35  ;;  %vm724_vm7 = vmand %vm692_vm5, %vm708_vm6 }
  0xcf   : > { %v1830_v26 = vsel %vm724_vm7, 1.0, %v1578_v2 }
  0xd0   : > { %v661_v28 = vmul.f32 %v597_v24, %v597_v24 }
  0xd2   : > { %v677_v31 = vadd.f32 %v661_v28, %v645_v27  ;;  %v369_v46 = vpop.permute.xlu1 %368  ;;  %v609_v27 = vmul.f32 %v425_v19, %v425_v19 }
  0xd3   : > { %v426_v33 = vsub.f32 %v369_v46, %v1721_v29 }
  0xd4   : > { %vm693_vm8 = vcmp.ge.f32.partialorder %v677_v31, 0.01  ;;  %vm709_vm9 = vcmp.lt.f32.partialorder %v677_v31, 0.64 }
  0xd5   : > { %vm725_vm10 = vmand %vm693_vm8, %vm709_vm9  ;;  %v610_v39 = vmul.f32 %v426_v33, %v426_v33 }
  0xd6   : > { %v1834_v34 = vsel %vm725_vm10, 1.0, %v1578_v2  ;;  %vm1335_vm11 = vmpackc.low %vm725_vm10, %vm724_vm7 }
  0xd7   : > { %v462_v37 = vpop.permute.xlu1 %461  ;;  %1412 = vmatprep.subr.msk.bf16.mxu0 %vm1335_vm11, %v1580_v52  ;;  %1441 = vmatprep.subr.msk.bf16.mxu1 %vm1335_vm11, %v1580_v52 }
  0xd8   : > { %v510_v38 = vsub.f32 %v462_v37, %v1724_v30  ;;  %1413 = vmatpush3.bf16.msk.msra.mxu0 %vm1335_vm11, %v1580_v52  ;;  %1449 = vmatpush3.bf16.msk.msra.mxu1 %vm1335_vm11, %v1580_v52 }
  0xda   : > { %v626_v40 = vmul.f32 %v510_v38, %v510_v38  ;;  %v530_v38 = vpop.permute.xlu0 %529 }
  0xdb   : > { %v466_v42 = vpop.permute.xlu1 %465 }
  0xdc   : > { %v642_v43 = vadd.f32 %v626_v40, %v610_v39  ;;  %v511_v44 = vsub.f32 %v466_v42, %v1724_v30  ;;  %v590_v40 = vsub.f32 %v530_v38, %v1730_v35 }
  0xde   : > { %v674_v51 = vadd.f32 %v658_v41, %v642_v43  ;;  %v627_v53 = vmul.f32 %v511_v44, %v511_v44  ;;  %v654_v49 = vmul.f32 %v590_v40, %v590_v40 }
  0xe0   : > { %vm690_vm12 = vcmp.ge.f32.partialorder %v674_v51, 0.01  ;;  %vm706_vm13 = vcmp.lt.f32.partialorder %v674_v51, 0.64  ;;  %v550_v55 = vpop.permute.xlu1 %549  ;;  %v643_v59 = vadd.f32 %v627_v53, %v611_v56 }
  0xe1   : > { %v595_v47 = vsub.f32 %v550_v55, %v1730_v35  ;;  %vm722_vm14 = vmand %vm690_vm12, %vm706_vm13  ;;  %v423_v55 = vsub.f32 %v1761_v60, %v1721_v29 }
  0xe2   : > { %v1847_v57 = vsel %vm722_vm14, 1.0, %v1578_v2 }
  0xe3   : > { %v659_v61 = vmul.f32 %v595_v47, %v595_v47 }
  0xe5   : > { %v675_v62 = vadd.f32 %v659_v61, %v643_v59  ;;  %v359_v0 = vpop.permute.xlu1 %358  ;;  %v607_v61 = vmul.f32 %v423_v55, %v423_v55 }
  0xe6   : > { %v424_v50 = vsub.f32 %v359_v0, %v1721_v29 }
  0xe7   : > { %vm691_vm15 = vcmp.ge.f32.partialorder %v675_v62, 0.01  ;;  %vm707_vm0 = vcmp.lt.f32.partialorder %v675_v62, 0.64 }
  0xe8   : > { %vm723_vm1 = vmand %vm691_vm15, %vm707_vm0  ;;  %v608_v11 = vmul.f32 %v424_v50, %v424_v50 }
  0xe9   : > { %v1851_v7 = vsel %vm723_vm1, 1.0, %v1578_v2  ;;  %vm1337_vm2 = vmpackc.low %vm723_vm1, %vm722_vm14 }
  0xea   : > { %v454_v9 = vpop.permute.xlu1 %453  ;;  %1414 = vmatprep.subr.msk.bf16.mxu0 %vm1337_vm2, %v1580_v52  ;;  %1442 = vmatprep.subr.msk.bf16.mxu1 %vm1337_vm2, %v1580_v52 }
  0xeb   : > { %v508_v10 = vsub.f32 %v454_v9, %v1724_v30  ;;  %1415 = vmatpush3.bf16.msk.msra.mxu0 %vm1337_vm2, %v1580_v52  ;;  %1450 = vmatpush3.bf16.msk.msra.mxu1 %vm1337_vm2, %v1580_v52 }
  0xed   : > { %v624_v12 = vmul.f32 %v508_v10, %v508_v10  ;;  %v522_v10 = vpop.permute.xlu0 %521 }
  0xee   : > { %v458_v15 = vpop.permute.xlu1 %457 }
  0xef   : > { %v640_v16 = vadd.f32 %v624_v12, %v608_v11  ;;  %v509_v18 = vsub.f32 %v458_v15, %v1724_v30 }
  0xf1   : > { %v672_v20 = vadd.f32 %v656_v14, %v640_v16  ;;  %v625_v21 = vmul.f32 %v509_v18, %v509_v18  ;;  %v588_v14 = vsub.f32 %v522_v10, %v1730_v35 }
  0xf3   : > { %vm688_vm3 = vcmp.ge.f32.partialorder %v672_v20, 0.01  ;;  %vm704_vm4 = vcmp.lt.f32.partialorder %v672_v20, 0.64  ;;  %v542_v24 = vpop.permute.xlu1 %541  ;;  %v641_v46 = vadd.f32 %v625_v21, %v609_v27  ;;  %v652_v20 = vmul.f32 %v588_v14, %v588_v14 }
  0xf4   : > { %v593_v28 = vsub.f32 %v542_v24, %v1730_v35  ;;  %vm720_vm5 = vmand %vm688_vm3, %vm704_vm4  ;;  %v421_v27 = vsub.f32 %v1766_v5, %v1721_v29  ;;  %v1533_v5 = vld [vmem:[%s2097_s0 + $0x30] sm:$0xff]  }
  0xf5   : > { %v1864_v31 = vsel %vm720_vm5, 1.0, %v1578_v2 }
  0xf6   : > { %v657_v32 = vmul.f32 %v593_v28, %v593_v28 }
  0xf8   : > { %v673_v33 = vadd.f32 %v657_v32, %v641_v46  ;;  %v349_v36 = vpop.permute.xlu1 %348 }
  0xf9   : > { %v422_v54 = vsub.f32 %v349_v36, %v1721_v29 }
  0xfa   : > { %vm689_vm6 = vcmp.ge.f32.partialorder %v673_v33, 0.01  ;;  %vm705_vm7 = vcmp.lt.f32.partialorder %v673_v33, 0.64  ;;  %v605_v33 = vmul.f32 %v421_v27, %v421_v27 }
  0xfb   : > { %vm721_vm8 = vmand %vm689_vm6, %vm705_vm7  ;;  %v606_v42 = vmul.f32 %v422_v54, %v422_v54 }
  0xfc   : > { %v1868_v37 = vsel %vm721_vm8, 1.0, %v1578_v2  ;;  %vm1339_vm9 = vmpackc.low %vm721_vm8, %vm720_vm5 }
  0xfd   : > { %v446_v39 = vpop.permute.xlu1 %445  ;;  %1416 = vmatprep.subr.msk.bf16.mxu0 %vm1339_vm9, %v1580_v52  ;;  %1443 = vmatprep.subr.msk.bf16.mxu1 %vm1339_vm9, %v1580_v52 }
  0xfe   : > { %v506_v41 = vsub.f32 %v446_v39, %v1724_v30  ;;  %1417 = vmatpush3.bf16.msk.msra.mxu0 %vm1339_vm9, %v1580_v52  ;;  %1451 = vmatpush3.bf16.msk.msra.mxu1 %vm1339_vm9, %v1580_v52 }
 0x100   : > { %v622_v43 = vmul.f32 %v506_v41, %v506_v41  ;;  %v1534_v41 = vld [vmem:[%s2097_s0 + $0x18] sm:$0xff]  }
 0x101   : > { %v450_v44 = vpop.permute.xlu1 %449 }
 0x102   : > { %v638_v51 = vadd.f32 %v622_v43, %v606_v42  ;;  %v507_v53 = vsub.f32 %v450_v44, %v1724_v30 }
 0x104   : > { %v670_v56 = vadd.f32 %v654_v49, %v638_v51  ;;  %v623_v47 = vmul.f32 %v507_v53, %v507_v53 }
 0x106   : > { %v534_v59 = vpop.permute.xlu1 %533  ;;  %vm686_vm10 = vcmp.ge.f32.partialorder %v670_v56, 0.01  ;;  %vm702_vm11 = vcmp.lt.f32.partialorder %v670_v56, 0.64  ;;  %v639_v6 = vadd.f32 %v623_v47, %v607_v61 }
 0x107   : > { %v591_v62 = vsub.f32 %v534_v59, %v1730_v35  ;;  %vm718_vm12 = vmand %vm686_vm10, %vm702_vm11 }
 0x108   : > { %v1881_v0 = vsel %vm718_vm12, 1.0, %v1578_v2 }
 0x109   : > { %v655_v50 = vmul.f32 %v591_v62, %v591_v62 }
 0x10b   : > { %v671_v8 = vadd.f32 %v655_v50, %v639_v6  ;;  %v339_v9 = vpop.permute.xlu1 %338 }
 0x10c   : > { %v420_v60 = vsub.f32 %v339_v9, %v1721_v29 }
 0x10d   : > { %vm687_vm13 = vcmp.ge.f32.partialorder %v671_v8, 0.01  ;;  %vm703_vm14 = vcmp.lt.f32.partialorder %v671_v8, 0.64 }
 0x10e   : > { %vm719_vm15 = vmand %vm687_vm13, %vm703_vm14  ;;  %v604_v16 = vmul.f32 %v420_v60, %v420_v60 }
 0x10f   : > { %v1885_v11 = vsel %vm719_vm15, 1.0, %v1578_v2  ;;  %vm1341_vm0 = vmpackc.low %vm719_vm15, %vm718_vm12 }
 0x110   : > { %1418 = vmatprep.subr.msk.bf16.mxu0 %vm1341_vm0, %v1580_v52  ;;  %1444 = vmatprep.subr.msk.bf16.mxu1 %vm1341_vm0, %v1580_v52  ;;  %v438_v12 = vpop.permute.xlu1 %437 }
 0x111   : > { %v504_v15 = vsub.f32 %v438_v12, %v1724_v30  ;;  %1419 = vmatpush3.bf16.msk.msra.mxu0 %vm1341_vm0, %v1580_v52  ;;  %1452 = vmatpush3.bf16.msk.msra.mxu1 %vm1341_vm0, %v1580_v52 }
 0x113   : > { %v620_v18 = vmul.f32 %v504_v15, %v504_v15 }
 0x114   : > { %v442_v19 = vpop.permute.xlu1 %441 }
 0x115   : > { %v636_v21 = vadd.f32 %v620_v18, %v604_v16  ;;  %v505_v24 = vsub.f32 %v442_v19, %v1724_v30  ;;  %v1530_v30 = vld [vmem:[%s2097_s0 + $0x8] sm:$0xff]  }
 0x117   : > { %v668_v28 = vadd.f32 %v652_v20, %v636_v21  ;;  %v621_v46 = vmul.f32 %v505_v24, %v505_v24 }
 0x119   : > { %v526_v32 = vpop.permute.xlu1 %525  ;;  %vm684_vm1 = vcmp.ge.f32.partialorder %v668_v28, 0.01  ;;  %vm700_vm2 = vcmp.lt.f32.partialorder %v668_v28, 0.64  ;;  %v637_v38 = vadd.f32 %v621_v46, %v605_v33 }
 0x11a   : > { %v589_v36 = vsub.f32 %v526_v32, %v1730_v35  ;;  %vm716_vm3 = vmand %vm684_vm1, %vm700_vm2  ;;  %v1531_v35 = vld [vmem:[%s2097_s0 + $0x28] sm:$0xff]  }
 0x11b   : > { %v1898_v54 = vsel %vm716_vm3, 1.0, %v1578_v2 }
 0x11c   : > { %v653_v39 = vmul.f32 %v589_v36, %v589_v36 }
 0x11e   : > { %v669_v40 = vadd.f32 %v653_v39, %v637_v38  ;;  %v332_v42 = vpop.permute.xlu1 %331 }
 0x11f   : > { %334 = vst [vmem:[#allocation3] sm:$0x7f] %v332_v42 }
 0x120   : > { %vm685_vm4 = vcmp.ge.f32.partialorder %v669_v40, 0.01  ;;  %vm701_vm5 = vcmp.lt.f32.partialorder %v669_v40, 0.64 }
 0x121   : > { %vm717_vm6 = vmand %vm685_vm4, %vm701_vm5 }
 0x122   : > { %v1901_v29 = vsel %vm717_vm6, 1.0, %v1578_v2  ;;  %vm1343_vm7 = vmpackc.low %vm717_vm6, %vm716_vm3  ;;  %v1532_v2 = vld [vmem:[%s2097_s0 + $0x10] sm:$0xff]  }
 0x123   : > { %1420 = vmatprep.subr.msk.bf16.mxu0 %vm1343_vm7, %v1580_v52  ;;  %1445 = vmatprep.subr.msk.bf16.mxu1 %vm1343_vm7, %v1580_v52 }
 0x124   : > { %1421 = vmatpush3.bf16.msk.msra.mxu0 %vm1343_vm7, %v1580_v52  ;;  %1453 = vmatpush3.bf16.msk.msra.mxu1 %vm1343_vm7, %v1580_v52  ;;  %v1535_v52 = vld [vmem:[%s2097_s0 + $0x38] sm:$0xff]  }
 0x127   : > { %1423 = vmatmul.mubr.bf16.vlgmr.msra.gmra.mxu0 %v1530_v30  ;;  %1431 = vmatmul.mubr.bf16.vlgmr.msra.gmra.mxu1 %v1531_v35 }
 0x128   : > { %1426 = vmatprep.mubr.bf16.mxu0 %v1532_v2  ;;  %1434 = vmatprep.mubr.bf16.mxu1 %v1533_v5 }
 0x12f   : > { %1427 = vmatmul.mubr.bf16.gmra.mxu0 %v1534_v41  ;;  %1435 = vmatmul.mubr.bf16.gmra.mxu1 %v1535_v52 }
 0x1e7   : > { %v1925_v43 = vpop.f32.mrf.mxu0  ;;  %v1927_v44 = vpop.f32.mrf.mxu1 }
 0x1e9   : > { %v1929_v49 = vpop.f32.mrf.mxu0  ;;  %v1931_v51 = vpop.f32.mrf.mxu1 }
 0x1eb   : > { %v1933_v53 = vpop.f32.mrf.mxu0  ;;  %v1935_v55 = vpop.f32.mrf.mxu1 }
 0x1ed   : > { %v1937_v56 = vpop.f32.mrf.mxu0  ;;  %v1939_v47 = vpop.f32.mrf.mxu1 }
 0x1ef   : > { %v1941_v59 = vpop.f32.mrf.mxu0  ;;  %v1943_v61 = vpop.f32.mrf.mxu1 }
 0x1f1   : > { %v1945_v62 = vpop.f32.mrf.mxu0  ;;  %v1947_v6 = vpop.f32.mrf.mxu1 }
 0x1f3   : > { %v1949_v50 = vpop.f32.mrf.mxu0  ;;  %v1951_v8 = vpop.f32.mrf.mxu1 }
 0x1f5   : > { %v1953_v9 = vpop.f32.mrf.mxu0  ;;  %v1955_v10 = vpop.f32.mrf.mxu1 }
 0x1f6 LB: >> { %v1581_v60 = vmov 0.0   ;;  %s1345_s30 = sshll.u32 %s1570_s29, 1  ;;  %s1388_s7 = sshll.u32 %s1570_s29, 4  ;;  %s1570_s29 = sphi %s1957_s29, %s938_s29  }
 0x1f7   : >> { %1085 = vmatprep.mubr.f32.mxu0 %v1581_v60  ;;  %s940_s5 = sadd.s32 1, %s1345_s30  ;;  %s1093_s8 = scalar_lea.vmem %s1643_s26, %s1388_s7 }
 0x1f8   : >> { %s941_s6 = scvt.s32.f32 %s940_s5  ;;  %v1094_v19 = vld [vmem:[%s1093_s8] sm:$0x7f]  ;;  %v1381_v21 = vld [vmem:[%s1093_s8 + $0x8] sm:$0x7f]  ;;  %s938_s29 = sadd.s32 1, %s1570_s29  }
 0x1f9   : >> { %p935_p5 = scmp.ge.s32.totalorder %s938_s29, 4  }
 0x1fa   : >> { %v942_v12 = vstv %s941_s6  ;;  %v1582_v46 = vmov (%p935_p5), 1966171168   ;;  %v1103_v36 = vcombine.high (%p935_p5), %v1951_v8, %v1951_v8  ;;  %s1572_s9 = smov (%p935_p5), 0  }
 0x1fb   : >> { %v943_v14 = vsub.f32 %v942_v12, %v1661_v4  ;;  %v1105_v32 = vunpack.c.l.s4 (%p935_p5), %v1582_v46 }
 0x1fd   : >> { %v982_v15 = vadd.f32 1.0, %v943_v14  ;;  %v1965_v16 = vrot.slane %v943_v14, %v1711_v23  ;;  %v1106_v38 = vunpack.c.0.s8 (%p935_p5), %v1105_v32 }
 0x1ff   : >> { %v1968_v18 = vrot.slane %v982_v15, %v1711_v23  ;;  %vm965_vm8 = vcmp.eq.f32.partialorder %v1951_v8, %v1965_v16  ;;  %vm964_vm11 = vcmp.eq.f32.partialorder %v1943_v61, %v1965_v16  ;;  %vm963_vm13 = vcmp.eq.f32.partialorder %v1955_v10, %v1965_v16 }
 0x200   : >> { %vm962_vm15 = vcmp.eq.f32.partialorder %v1947_v6, %v1965_v16  ;;  %vm961_vm1 = vcmp.eq.f32.partialorder %v1935_v55, %v1965_v16  ;;  %vm960_vm3 = vcmp.eq.f32.partialorder %v1927_v44, %v1965_v16  ;;  %vm959_vm5 = vcmp.eq.f32.partialorder %v1939_v47, %v1965_v16 }
 0x201   : >> { %vm1004_vm9 = vcmp.eq.f32.partialorder %v1951_v8, %v1968_v18  ;;  %vm1003_vm10 = vcmp.eq.f32.partialorder %v1943_v61, %v1968_v18  ;;  %vm1002_vm12 = vcmp.eq.f32.partialorder %v1955_v10, %v1968_v18  ;;  %vm1001_vm14 = vcmp.eq.f32.partialorder %v1947_v6, %v1968_v18 }
 0x202   : >> { %1346 = vmatprep.subr.msk.mxu0 %vm1004_vm9, %v1745_v48  ;;  %vm1000_vm0 = vcmp.eq.f32.partialorder %v1935_v55, %v1968_v18  ;;  %vm999_vm2 = vcmp.eq.f32.partialorder %v1927_v44, %v1968_v18  ;;  %vm998_vm4 = vcmp.eq.f32.partialorder %v1939_v47, %v1968_v18  ;;  %vm997_vm6 = vcmp.eq.f32.partialorder %v1931_v51, %v1968_v18 }
 0x203   : >> { %1347 = vmatpush1.msk.msra.mxu0 %vm965_vm8, %v1745_v48  ;;  %vm958_vm7 = vcmp.eq.f32.partialorder %v1931_v51, %v1965_v16  ;;  %vm996_vm8 = vcmp.eq.f32.partialorder %v1949_v50, %v1968_v18  ;;  %vm957_vm9 = vcmp.eq.f32.partialorder %v1949_v50, %v1965_v16  ;;  %v1109_v39 = vsub.s32 (%p935_p5), %v1106_v38, %v1704_v22 }
 0x204   : >> { %1348 = vmatprep.subr.msk.mxu0 %vm1003_vm10, %v1794_v45  ;;  %vm995_vm10 = vcmp.eq.f32.partialorder %v1941_v59, %v1968_v18 }
 0x205   : >> { %1349 = vmatpush1.msk.msra.mxu0 %vm964_vm11, %v1794_v45  ;;  %vm956_vm11 = vcmp.eq.f32.partialorder %v1941_v59, %v1965_v16  ;;  %v1110_v40 = vrot.slane (%p935_p5), %v1103_v36, %v1109_v39 }
 0x206   : >> { %1350 = vmatprep.subr.msk.mxu0 %vm1002_vm12, %v1777_v13  ;;  %vm994_vm12 = vcmp.eq.f32.partialorder %v1953_v9, %v1968_v18 }
 0x207   : >> { %1351 = vmatpush1.msk.msra.mxu0 %vm963_vm13, %v1777_v13  ;;  %vm955_vm13 = vcmp.eq.f32.partialorder %v1953_v9, %v1965_v16  ;;  %v1111_v30 = vcombine.high (%p935_p5), %v1110_v40, %v1110_v40 }
 0x208   : >> { %1352 = vmatprep.subr.msk.mxu0 %vm1001_vm14, %v1804_v58  ;;  %vm993_vm14 = vcmp.eq.f32.partialorder %v1945_v62, %v1968_v18 }
 0x209   : >> { %1353 = vmatpush1.msk.msra.mxu0 %vm962_vm15, %v1804_v58  ;;  %vm954_vm15 = vcmp.eq.f32.partialorder %v1945_v62, %v1965_v16  ;;  %v1118_v35 = vrot.slane (%p935_p5), %v1111_v30, %v1109_v39 }
 0x20a   : >> { %1354 = vmatprep.subr.msk.mxu0 %vm1000_vm0, %v1817_v3  ;;  %vm992_vm0 = vcmp.eq.f32.partialorder %v1933_v53, %v1968_v18 }
 0x20b   : >> { %1355 = vmatpush1.msk.msra.mxu0 %vm961_vm1, %v1817_v3  ;;  %vm953_vm1 = vcmp.eq.f32.partialorder %v1933_v53, %v1965_v16  ;;  %v1119_v2 = vcombine.high (%p935_p5), %v1118_v35, %v1118_v35 }
 0x20c   : >> { %1356 = vmatprep.subr.msk.mxu0 %vm999_vm2, %v1813_v63  ;;  %vm991_vm2 = vcmp.eq.f32.partialorder %v1925_v43, %v1968_v18 }
 0x20d   : >> { %1357 = vmatpush1.msk.msra.mxu0 %vm960_vm3, %v1813_v63  ;;  %vm952_vm3 = vcmp.eq.f32.partialorder %v1925_v43, %v1965_v16  ;;  %v1121_v5 = vadd.f32 (%p935_p5), %v1119_v2, %v1661_v4 }
 0x20e   : >> { %1358 = vmatprep.subr.msk.mxu0 %vm998_vm4, %v1834_v34  ;;  %vm990_vm4 = vcmp.eq.f32.partialorder %v1937_v56, %v1968_v18 }
 0x20f   : >> { %1359 = vmatpush1.msk.msra.mxu0 %vm959_vm5, %v1834_v34  ;;  %vm951_vm5 = vcmp.eq.f32.partialorder %v1937_v56, %v1965_v16  ;;  %1122 = vst [vmem:[#allocation2] sm:$0x1] (%p935_p5), %v1121_v5 }
 0x210   : >> { %1360 = vmatprep.subr.msk.mxu0 %vm997_vm6, %v1830_v26  ;;  %vm989_vm6 = vcmp.eq.f32.partialorder %v1929_v49, %v1968_v18 }
 0x211   : >> { %1361 = vmatpush1.msk.msra.mxu0 %vm958_vm7, %v1830_v26  ;;  %vm950_vm7 = vcmp.eq.f32.partialorder %v1929_v49, %v1965_v16 }
 0x212   : >> { %1362 = vmatprep.subr.msk.mxu0 %vm996_vm8, %v1851_v7  ;;  %vm1126_vm8 = vcmask (%p935_p5), 1042432  }
 0x213   : >> { %1363 = vmatpush1.msk.msra.mxu0 %vm957_vm9, %v1851_v7  ;;  %v1127_v33 = vsel (%p935_p5), %vm1126_vm8, %v1715_v25, 0.0  ;;  %vm1128_vm9 = vcmp.ge.f32.partialorder (%p935_p5), %v1121_v5, 1.0 }
 0x214   : >> { %1364 = vmatprep.subr.msk.mxu0 %vm995_vm10, %v1847_v57  ;;  %v1131_v48 = vsel (%p935_p5), %vm1128_vm9, 1, %v1577_v1 }
 0x215   : >> { %1365 = vmatpush1.msk.msra.mxu0 %vm956_vm11, %v1847_v57  ;;  %v1135_v25 = vrot.slane (%p935_p5), %v1131_v48, %v1711_v23 }
 0x216   : >> { %1366 = vmatprep.subr.msk.mxu0 %vm994_vm12, %v1868_v37 }
 0x217   : >> { %1367 = vmatpush1.msk.msra.mxu0 %vm955_vm13, %v1868_v37  ;;  %vm2080_vm10 = vcmp.eq.s32.totalorder (%p935_p5), %v1135_v25, 1 }
 0x218   : >> { %1368 = vmatprep.subr.msk.mxu0 %vm993_vm14, %v1864_v31 }
 0x219   : >> { %1369 = vmatpush1.msk.msra.mxu0 %vm954_vm15, %v1864_v31 }
 0x21a   : >> { %1370 = vmatprep.subr.msk.mxu0 %vm992_vm0, %v1885_v11 }
 0x21b   : >> { %1371 = vmatpush1.msk.msra.mxu0 %vm953_vm1, %v1885_v11 }
 0x21c   : >> { %1372 = vmatprep.subr.msk.mxu0 %vm991_vm2, %v1881_v0 }
 0x21d   : >> { %1373 = vmatpush1.msk.msra.mxu0 %vm952_vm3, %v1881_v0 }
 0x21e   : >> { %1374 = vmatprep.subr.msk.mxu0 %vm990_vm4, %v1901_v29 }
 0x21f   : >> { %1375 = vmatpush1.msk.msra.mxu0 %vm951_vm5, %v1901_v29 }
 0x220   : >> { %1376 = vmatprep.subr.msk.mxu0 %vm989_vm6, %v1898_v54 }
 0x221   : >> { %1377 = vmatpush1.msk.msra.mxu0 %vm950_vm7, %v1898_v54 }
 0x222   : >> { %1086 = vmatmul.mubr.f32.vlgmr.msra.gmra.mxu0 %v1784_v17  ;;  %v1130_v17 = vld [vmem:[#allocation3] sm:$0x7f] (%p935_p5) }
 0x2e2   : >> { %v1087_v20 = vpop.f32.mrf.mxu0 }
 0x2e3   : >> { %v1095_v24 = vadd.f32 %v1094_v19, %v1087_v20  ;;  %937 = sbr.rel (!%p935_p5) target bundleno = 502 (0x1f6), region = 97 }
 0x2e4   : >> { %v1089_v27 = vpop.f32.mrf.mxu0 }
 0x2e5   : >> { %1096 = vst [vmem:[%s1093_s8] sm:$0x7f] %v1095_v24  ;;  %v1100_v28 = vadd.f32 %v1381_v21, %v1089_v27 }
 0x2e7   : >> { %1382 = vst [vmem:[%s1093_s8 + $0x8] sm:$0x7f] %v1100_v28 }
 0x2ee   : > { %v1129_v13 = vld [vmem:[%s1643_s26] sm:$0x7f] }
 0x2ef   : > { %v1137_v22 = vsel %vm2080_vm10, %v1129_v13, %v1130_v17 }
 0x2f0 LB: >> { %s1144_s10 = sadd.s32 1, %s1574_s9   ;;  %s1383_s11 = sshll.u32 %s1574_s9, 3  ;;  %v1583_v4 = vmov 0   ;;  %s1574_s9 = sphi %s1572_s9, %s1573_s9  }
 0x2f1   : >> { %s1145_s12 = scvt.s32.f32 %s1144_s10  ;;  %s1149_s13 = scalar_lea.vmem %s1643_s26, %s1383_s11 }
 0x2f2   : >> { %v1150_v63 = vld [vmem:[%s1149_s13] sm:$0x7f]  ;;  %p1140_p6 = scmp.ge.s32.totalorder %s1144_s10, 8   ;;  %s1573_s9 = smov %s1144_s10  }
 0x2f3   : >> { %v1146_v1 = vstv %s1145_s12 }
 0x2f4   : >> { %vm1147_vm11 = vcmp.ge.f32.partialorder %v1121_v5, %v1146_v1 }
 0x2f5   : >> { %v1151_v58 = vsel %vm1147_vm11, 1, %v1583_v4 }
 0x2f6   : >> { %v1155_v3 = vrot.slane %v1151_v58, %v1711_v23 }
 0x2f8   : >> { %vm1156_vm12 = vcmp.eq.s32.totalorder %v1155_v3, 1  ;;  %1142 = sbr.rel (!%p1140_p6) target bundleno = 752 (0x2f0), region = 108 }
 0x2f9   : >> { %v1157_v26 = vsel %vm1156_vm12, %v1150_v63, %v1137_v22 }
 0x2fa   : >> { %v1158_v34 = vsub.f32 %v1157_v26, %v1127_v33 }
 0x2fc   : >> { %1159 = vst [vmem:[%s1149_s13] sm:$0x7f] %v1158_v34 }
 0x2fd PF: > { %s14_s17 = sadd.s32 1, %s1566_s17   ;;  %s2108_s15 = smov %s1562_s16 }
 0x2fe   : > { %p11_p7 = scmp.ge.s32.totalorder %s14_s17, 4   ;;  %s2109_s16 = smov %s2111_s18 }
 0x300   :  { %13 = sbr.rel (!%p11_p7) target bundleno = 2 (0x2), region = 119 }

</bundles_post_ra>
